<compile_context>
chip_gen: v5e
topology: v5e:2x2
jax: 0.10.0
libtpu: 0.0.40
codegen_flags: <defaults>
</compile_context>

<pallas_src>
import jax
import jax.numpy as jnp
from jax.experimental import pallas as pl
from jax.experimental.pallas import tpu as pltpu

LANE = 128      # lane width (last-dim native size)
SUBLANE = 8     # sublane multiple for f32


def _round_up(n, m):
    return ((n + m - 1) // m) * m


def _mlp_kernel(x_ref, w1_ref, w2_ref, w3_ref, shifts_ref, o_ref):
    h_w = w1_ref.shape[1]    # padded hidden width (static)
    o_w = w3_ref.shape[1]    # padded output width (static)
    t1 = shifts_ref[0:1, :h_w]   # folded bn1 shift (bias + BN affine)
    t2 = shifts_ref[1:2, :h_w]   # folded bn2 shift
    b3 = shifts_ref[2:3, :o_w]   # fc3 bias

    # Layer 1: fc1 (+ folded bn1 scale in W1) + shift + ReLU; dropout = id (eval).
    h1 = jnp.maximum(
        jnp.dot(x_ref[...], w1_ref[...], preferred_element_type=jnp.float32) + t1,
        0.0)
    # Layer 2: fc2 (+ folded bn2 scale in W2) + shift + ReLU; dropout = id (eval).
    h2 = jnp.maximum(
        jnp.dot(h1.astype(jnp.bfloat16), w2_ref[...],
                preferred_element_type=jnp.float32) + t2,
        0.0)
    # Layer 3: fc3 logits (lane-padded -> unmasked stores), kept f32.
    o_ref[...] = jnp.dot(h2.astype(jnp.bfloat16), w3_ref[...],
                         preferred_element_type=jnp.float32) + b3


def mlp_forward(x, params, *, output_size):
    """Fused forward pass. x: (B, input_size) float32. Returns (B, output_size) f32 logits."""
    w1, w2, w3, shifts = params
    B, d_in = x.shape
    d_in_pad, hp = w1.shape
    d_out_pad = w3.shape[1]
    shift_rows, shift_w = shifts.shape

    # Pad batch to a sublane multiple; pad/cast features to the bf16 lane-padded layout.
    b_pad = _round_up(B, SUBLANE)
    xp = jnp.zeros((b_pad, d_in_pad), jnp.bfloat16).at[:B, :d_in].set(
        x.astype(jnp.bfloat16))

    def full(shape):
        # whole array as one resident block (single grid step)
        return pl.BlockSpec(shape, lambda i: (0, 0))

    flops = 2 * b_pad * (d_in_pad * hp + hp * hp + hp * d_out_pad)
    bytes_accessed = (2 * (b_pad * d_in_pad + d_in_pad * hp + hp * hp + hp * d_out_pad)
                      + 4 * (shift_rows * shift_w + b_pad * d_out_pad))

    out = pl.pallas_call(
        _mlp_kernel,
        out_shape=jax.ShapeDtypeStruct((b_pad, d_out_pad), jnp.float32),
        grid_spec=pl.GridSpec(
            grid=(1,),                             # nothing to pipeline at these sizes
            in_specs=[
                full((b_pad, d_in_pad)),           # x (bf16)
                full((d_in_pad, hp)),              # W1 * bn1_scale (bf16)
                full((hp, hp)),                    # W2 * bn2_scale (bf16)
                full((hp, d_out_pad)),             # W3 (bf16)
                full((shift_rows, shift_w)),       # stacked shifts (f32)
            ],
            out_specs=full((b_pad, d_out_pad)),
        ),
        compiler_params=pltpu.CompilerParams(
            dimension_semantics=("arbitrary",)),
        cost_estimate=pl.CostEstimate(
            flops=flops, transcendentals=0, bytes_accessed=bytes_accessed),
    )(xp, w1, w2, w3, shifts)

    return out[:B, :output_size]


def init_params(key, input_size, hidden_size, output_size):
    """PyTorch-default init (uniform +/- 1/sqrt(fan_in)); BN folded; bf16 lane-padded weights."""
    ks = jax.random.split(key, 6)

    def linear(kw, kb, fan_in, fan_out):
        bound = 1.0 / float(fan_in) ** 0.5
        w = jax.random.uniform(kw, (fan_in, fan_out), jnp.float32, -bound, bound)
        b = jax.random.uniform(kb, (fan_out,), jnp.float32, -bound, bound)
        return w, b

    w1, b1 = linear(ks[0], ks[1], input_size, hidden_size)
    w2, b2 = linear(ks[2], ks[3], hidden_size, hidden_size)
    w3, b3 = linear(ks[4], ks[5], hidden_size, output_size)

    eps = 1e-5
    # BatchNorm1d fresh-module defaults: gamma=1, beta=0, running_mean=0, running_var=1.
    # TODO(synk): if trained BN stats / affine params are loaded, fold them here instead.
    def fold_bn(w, bias, n):
        gamma = jnp.ones((n,), jnp.float32)
        beta = jnp.zeros((n,), jnp.float32)
        r_mean = jnp.zeros((n,), jnp.float32)
        r_var = jnp.ones((n,), jnp.float32)
        scale = gamma / jnp.sqrt(r_var + eps)       # per-feature scale
        return w * scale, beta + scale * (bias - r_mean)

    w1f, t1 = fold_bn(w1, b1, hidden_size)
    w2f, t2 = fold_bn(w2, b2, hidden_size)

    d_in_pad = _round_up(input_size, LANE)
    hp = _round_up(hidden_size, LANE)
    d_out_pad = _round_up(output_size, LANE)

    def pad2(w, rows, cols):
        return jnp.zeros((rows, cols), jnp.float32).at[:w.shape[0], :w.shape[1]].set(w)

    # Zero padding preserves semantics: padded hidden columns see zero weight
    # and zero shift -> ReLU(0)=0, and contribute nothing downstream.
    w1p = pad2(w1f, d_in_pad, hp).astype(jnp.bfloat16)
    w2p = pad2(w2f, hp, hp).astype(jnp.bfloat16)
    w3p = pad2(w3, hp, d_out_pad).astype(jnp.bfloat16)

    # One (8, 128)-padded f32 buffer holding all per-layer shift rows.
    shift_w = max(hp, d_out_pad)
    shifts = jnp.zeros((SUBLANE, shift_w), jnp.float32)
    shifts = shifts.at[0, :hidden_size].set(t1)
    shifts = shifts.at[1, :hidden_size].set(t2)
    shifts = shifts.at[2, :output_size].set(b3)

    return (w1p, w2p, w3p, shifts)


def reference_forward(x, params, *, output_size):
    """Pure-JAX reference matching the kernel's bf16-operand / f32-accumulate path."""
    w1, w2, w3, shifts = params
    d_in_pad, hp = w1.shape
    d_out_pad = w3.shape[1]
    B, d_in = x.shape
    xp = jnp.zeros((B, d_in_pad), jnp.float32).at[:, :d_in].set(x).astype(jnp.bfloat16)
    t1 = shifts[0:1, :hp]
    t2 = shifts[1:2, :hp]
    b3 = shifts[2:3, :d_out_pad]
    h1 = jnp.maximum(jnp.dot(xp, w1, preferred_element_type=jnp.float32) + t1, 0.0)
    h2 = jnp.maximum(jnp.dot(h1.astype(jnp.bfloat16), w2,
                             preferred_element_type=jnp.float32) + t2, 0.0)
    out = jnp.dot(h2.astype(jnp.bfloat16), w3, preferred_element_type=jnp.float32) + b3
    return out[:, :output_size]


if __name__ == "__main__":
    # Small shapes consistent with the module: input_size = #features after
    # StandardScaler, hidden_size = 64 (per spec), output_size = #classes.
    batch, input_size, hidden_size, output_size = 16, 16, 64, 4

    key = jax.random.PRNGKey(0)
    k_x, k_p = jax.random.split(key)
    x = jax.random.normal(k_x, (batch, input_size), jnp.float32)
    params = init_params(k_p, input_size, hidden_size, output_size)

    out = mlp_forward(x, params, output_size=output_size)
    out = jax.block_until_ready(out)

    ref = reference_forward(x, params, output_size=output_size)
    assert out.shape == (batch, output_size)
    assert jnp.allclose(out, ref, atol=5e-3, rtol=5e-3), "mismatch vs reference"

    print("KERNEL_OK")
</pallas_src>

<mosaic_0001>
module attributes {stable_mosaic.version = 11 : i64} {
  func.func @_mlp_kernel(%arg0: i32, %arg1: memref<16x128xbf16, #tpu.memory_space<vmem>>, %arg2: memref<128x128xbf16, #tpu.memory_space<vmem>>, %arg3: memref<128x128xbf16, #tpu.memory_space<vmem>>, %arg4: memref<128x128xbf16, #tpu.memory_space<vmem>>, %arg5: memref<8x128xf32, #tpu.memory_space<vmem>>, %arg6: memref<16x128xf32, #tpu.memory_space<vmem>>) attributes {dimension_semantics = [#tpu.dimension_semantics<arbitrary>], iteration_bounds = array<i64: 1>, scalar_prefetch = 0 : i64, scratch_operands = 0 : i64, tpu.core_type = #tpu.core_type<tc>, window_params = [{pipeline_mode = #tpu.pipeline_mode<synchronous>, transform_indices = @transform_0, window_bounds = array<i64: 16, 128>}, {pipeline_mode = #tpu.pipeline_mode<synchronous>, transform_indices = @transform_1, window_bounds = array<i64: 128, 128>}, {pipeline_mode = #tpu.pipeline_mode<synchronous>, transform_indices = @transform_2, window_bounds = array<i64: 128, 128>}, {pipeline_mode = #tpu.pipeline_mode<synchronous>, transform_indices = @transform_3, window_bounds = array<i64: 128, 128>}, {pipeline_mode = #tpu.pipeline_mode<synchronous>, transform_indices = @transform_4, window_bounds = array<i64: 8, 128>}, {pipeline_mode = #tpu.pipeline_mode<synchronous>, transform_indices = @transform_5, window_bounds = array<i64: 16, 128>}]} {
    %c0 = arith.constant 0 : index
    %c0_0 = arith.constant 0 : index
    %0 = vector.load %arg5[%c0, %c0_0] : memref<8x128xf32, #tpu.memory_space<vmem>>, vector<1x128xf32>
    %c1 = arith.constant 1 : index
    %c0_1 = arith.constant 0 : index
    %1 = vector.load %arg5[%c1, %c0_1] : memref<8x128xf32, #tpu.memory_space<vmem>>, vector<1x128xf32>
    %c2 = arith.constant 2 : index
    %c0_2 = arith.constant 0 : index
    %2 = vector.load %arg5[%c2, %c0_2] : memref<8x128xf32, #tpu.memory_space<vmem>>, vector<1x128xf32>
    %c0_3 = arith.constant 0 : index
    %c0_4 = arith.constant 0 : index
    %3 = vector.load %arg1[%c0_3, %c0_4] : memref<16x128xbf16, #tpu.memory_space<vmem>>, vector<16x128xbf16>
    %c0_5 = arith.constant 0 : index
    %c0_6 = arith.constant 0 : index
    %4 = vector.load %arg2[%c0_5, %c0_6] : memref<128x128xbf16, #tpu.memory_space<vmem>>, vector<128x128xbf16>
    %cst = arith.constant dense<0.000000e+00> : vector<16x128xf32>
    %5 = tpu.matmul %3, %4, %cst {dimension_numbers = #tpu.dot_dimension_numbers<[1], [0], [0], [1], [0, 0, 1, 1], [], []>} : vector<16x128xbf16>, vector<128x128xbf16>, vector<16x128xf32> -> vector<16x128xf32>
    %6 = vector.broadcast %0 : vector<1x128xf32> to vector<16x128xf32>
    %7 = arith.addf %5, %6 : vector<16x128xf32>
    %cst_7 = arith.constant 0.000000e+00 : f32
    %8 = vector.broadcast %cst_7 : f32 to vector<16x128xf32>
    %9 = arith.maximumf %7, %8 : vector<16x128xf32>
    %10 = arith.truncf %9 : vector<16x128xf32> to vector<16x128xbf16>
    %c0_8 = arith.constant 0 : index
    %c0_9 = arith.constant 0 : index
    %11 = vector.load %arg3[%c0_8, %c0_9] : memref<128x128xbf16, #tpu.memory_space<vmem>>, vector<128x128xbf16>
    %cst_10 = arith.constant dense<0.000000e+00> : vector<16x128xf32>
    %12 = tpu.matmul %10, %11, %cst_10 {dimension_numbers = #tpu.dot_dimension_numbers<[1], [0], [0], [1], [0, 0, 1, 1], [], []>} : vector<16x128xbf16>, vector<128x128xbf16>, vector<16x128xf32> -> vector<16x128xf32>
    %13 = vector.broadcast %1 : vector<1x128xf32> to vector<16x128xf32>
    %14 = arith.addf %12, %13 : vector<16x128xf32>
    %cst_11 = arith.constant 0.000000e+00 : f32
    %15 = vector.broadcast %cst_11 : f32 to vector<16x128xf32>
    %16 = arith.maximumf %14, %15 : vector<16x128xf32>
    %17 = arith.truncf %16 : vector<16x128xf32> to vector<16x128xbf16>
    %c0_12 = arith.constant 0 : index
    %c0_13 = arith.constant 0 : index
    %18 = vector.load %arg4[%c0_12, %c0_13] : memref<128x128xbf16, #tpu.memory_space<vmem>>, vector<128x128xbf16>
    %cst_14 = arith.constant dense<0.000000e+00> : vector<16x128xf32>
    %19 = tpu.matmul %17, %18, %cst_14 {dimension_numbers = #tpu.dot_dimension_numbers<[1], [0], [0], [1], [0, 0, 1, 1], [], []>} : vector<16x128xbf16>, vector<128x128xbf16>, vector<16x128xf32> -> vector<16x128xf32>
    %20 = vector.broadcast %2 : vector<1x128xf32> to vector<16x128xf32>
    %21 = arith.addf %19, %20 : vector<16x128xf32>
    %c0_15 = arith.constant 0 : index
    %c0_16 = arith.constant 0 : index
    %22 = vector.load %arg6[%c0_15, %c0_16] : memref<16x128xf32, #tpu.memory_space<vmem>>, vector<16x128xf32>
    tpu.vector_store %arg6[%c0_15, %c0_16], %21 {strides = array<i32>} : memref<16x128xf32, #tpu.memory_space<vmem>>, vector<16x128xf32>,
    return
  }
  func.func @transform_0(%arg0: i32) -> (i32, i32) {
    %c0_i32 = arith.constant 0 : i32
    %c0_i32_0 = arith.constant 0 : i32
    %c0_i32_1 = arith.constant 0 : i32
    return %c0_i32, %c0_i32_0 : i32, i32
  }
  func.func @transform_1(%arg0: i32) -> (i32, i32) {
    %c0_i32 = arith.constant 0 : i32
    %c0_i32_0 = arith.constant 0 : i32
    %c0_i32_1 = arith.constant 0 : i32
    return %c0_i32, %c0_i32_0 : i32, i32
  }
  func.func @transform_2(%arg0: i32) -> (i32, i32) {
    %c0_i32 = arith.constant 0 : i32
    %c0_i32_0 = arith.constant 0 : i32
    %c0_i32_1 = arith.constant 0 : i32
    return %c0_i32, %c0_i32_0 : i32, i32
  }
  func.func @transform_3(%arg0: i32) -> (i32, i32) {
    %c0_i32 = arith.constant 0 : i32
    %c0_i32_0 = arith.constant 0 : i32
    %c0_i32_1 = arith.constant 0 : i32
    return %c0_i32, %c0_i32_0 : i32, i32
  }
  func.func @transform_4(%arg0: i32) -> (i32, i32) {
    %c0_i32 = arith.constant 0 : i32
    %c0_i32_0 = arith.constant 0 : i32
    %c0_i32_1 = arith.constant 0 : i32
    return %c0_i32, %c0_i32_0 : i32, i32
  }
  func.func @transform_5(%arg0: i32) -> (i32, i32) {
    %c0_i32 = arith.constant 0 : i32
    %c0_i32_0 = arith.constant 0 : i32
    %c0_i32_1 = arith.constant 0 : i32
    return %c0_i32, %c0_i32_0 : i32, i32
  }
}

</mosaic_0001>

<bundles_post_ra>
// kernel: tpu_custom_call.1
= control target key start
LH: loop header
LB: loop body
LE: loop exit
PB: predicated region body
PF: predicated region fallthrough
CT: control target
= control target key end

     0   :  { %10 = vsyncpa [#allocation3], 0  ;;  %s722_s0 = inlined_call_operand.hbm [shape: bf16[16,128], index: 0, kind: input, shape index: {}]   ;;  %s723_s1 = inlined_call_operand.hbm [shape: bf16[128,128], index: 1, kind: input, shape index: {}]   ;;  %s724_s2 = inlined_call_operand.hbm [shape: bf16[128,128], index: 2, kind: input, shape index: {}]   ;;  %s725_s3 = inlined_call_operand.hbm [shape: bf16[128,128], index: 3, kind: input, shape index: {}]   ;;  %s726_s4 = inlined_call_operand.hbm [shape: f32[8,128], index: 4, kind: input, shape index: {}]   ;;  %s727_s5 = inlined_call_operand.hbm [shape: f32[16,128], index: 5, kind: output, shape index: {}]  }
   0x1   :  { %11 = vsyncpa [#allocation6], 0 }
   0x2   :  { %12 = vsyncpa [#allocation9], 0 }
   0x3   :  { %13 = vsyncpa [#allocation4], 0  ;;  %s31_s20 = sshll.u32 %s723_s1, 4  ;;  %s664_s21 = smov [#allocation5]   ;;  %s32_s20 = int_to_ptr.hbm [resolvable:$true] %s31_s20 }
   0x4   :  { %s33_s22 = sshll.u32 %s664_s21, 4  ;;  %s57_s25 = sshll.u32 %s725_s3, 4  ;;  %s34_s22 = int_to_ptr.vmem [resolvable:$true] %s33_s22  ;;  %s58_s25 = int_to_ptr.hbm [resolvable:$true] %s57_s25 }
   0x5   :  { %s665_s26 = smov 64   ;;  %s666_s27 = smov 4  }
   0x6   :  { %39 = dma.hbm_to_vmem [thread:$0]  %s32_s20, 1024, %s34_s22, [#allocation6], %s665_s26, %s665_s26, %s666_s27  }
   0x7   :  { %s667_s28 = smov [#allocation8]   ;;  %s18_s7 = sshll.u32 %s722_s0, 4  ;;  %s19_s7 = int_to_ptr.hbm [resolvable:$true] %s18_s7 }
   0x8   :  { %s59_s29 = sshll.u32 %s667_s28, 4  ;;  %s44_s9 = sshll.u32 %s724_s2, 4  ;;  %s60_s29 = int_to_ptr.vmem [resolvable:$true] %s59_s29  ;;  %s45_s9 = int_to_ptr.hbm [resolvable:$true] %s44_s9 }
   0x9   :  { %65 = dma.hbm_to_vmem [thread:$0]  %s58_s25, 1024, %s60_s29, [#allocation9], %s665_s26, %s665_s26, %s666_s27  }
   0xa   :  { %s668_s10 = smov [#allocation2]   ;;  %s669_s3 = smov [#allocation7]  }
   0xb   :  { %s20_s11 = sshll.u32 %s668_s10, 4  ;;  %s46_s12 = sshll.u32 %s669_s3, 4  ;;  %s21_s11 = int_to_ptr.vmem [resolvable:$true] %s20_s11  ;;  %s47_s12 = int_to_ptr.vmem [resolvable:$true] %s46_s12 }
   0xc   :  { %26 = dma.hbm_to_vmem [thread:$0]  %s19_s7, 128, %s21_s11, [#allocation3], %s665_s26, %s665_s26, %s666_s27  }
   0xd   :  { %s71_s15 = sshll.u32 %s726_s4, 4  ;;  %s670_s0 = smov [#allocation10]   ;;  %s72_s15 = int_to_ptr.hbm [resolvable:$true] %s71_s15 }
   0xe   :  { %52 = dma.hbm_to_vmem [thread:$0]  %s45_s9, 1024, %s47_s12, [#allocation6], %s665_s26, %s665_s26, %s666_s27  }
   0xf   :  { %s73_s16 = sshll.u32 %s670_s0, 4  ;;  %s74_s16 = int_to_ptr.vmem [resolvable:$true] %s73_s16 }
  0x10   :  { %76 = dma.hbm_to_vmem [thread:$0]  %s72_s15, 128, %s74_s16, [#allocation9]  }
  0x11   :  { %656 = dma.done.wait [#allocation3], 128  }
  0x12   :  { %657 = vsyncadd [#allocation3], 4294967168 }
  0x13   :  { %658 = dma.done.wait [#allocation6], 2048  }
  0x14   :  { %659 = vsyncadd [#allocation6], 4294965248 }
  0x15   :  { %660 = dma.done.wait [#allocation9], 1152  }
  0x16   :  { %661 = vsyncadd [#allocation9], 4294966144  ;;  %v482_v0 = vld [vmem:[#allocation5 + $0x38] sm:$0xff]  ;;  %v481_v1 = vld [vmem:[#allocation5 + $0x30] sm:$0xff]  ;;  %s671_s2 = smov [#allocation11]   ;;  %s359_s19 = sshll.u32 %s727_s5, 4  ;;  %s360_s19 = int_to_ptr.hbm [resolvable:$true] %s359_s19 }
  0x17   :  { %173 = vmatpush.bf16.msra.mxu0 %v482_v0  ;;  %v490_v2 = vld [vmem:[#allocation7 + $0x38] sm:$0xff]  ;;  %v489_v3 = vld [vmem:[#allocation7 + $0x30] sm:$0xff]  ;;  %v480_v4 = vld [vmem:[#allocation5 + $0x28] sm:$0xff]  ;;  %s357_s4 = sshll.u32 %s671_s2, 4  ;;  %s672_s20 = smov 128   ;;  %s358_s4 = int_to_ptr.vmem [resolvable:$true] %s357_s4 }
  0x18   :  { %255 = vmatpush.bf16.msra.mxu1 %v490_v2  ;;  %v488_v5 = vld [vmem:[#allocation7 + $0x28] sm:$0xff]  ;;  %v479_v6 = vld [vmem:[#allocation5 + $0x20] sm:$0xff]  ;;  %v478_v8 = vld [vmem:[#allocation5 + $0x18] sm:$0xff]  ;;  %s673_s21 = smov 8  }
  0x19   :  { %v487_v7 = vld [vmem:[#allocation7 + $0x20] sm:$0xff]  ;;  %v477_v9 = vld [vmem:[#allocation5 + $0x10] sm:$0xff]  ;;  %v476_v10 = vld [vmem:[#allocation5 + $0x8] sm:$0xff] }
  0x1a   :  { %v475_v11 = vld [vmem:[#allocation5] sm:$0xff]  ;;  %v474_v12 = vld [vmem:[#allocation2] sm:$0xff]  ;;  %v485_v14 = vld [vmem:[#allocation7 + $0x10] sm:$0xff] }
  0x1b   :  { %174 = vmatpush.bf16.msra.mxu0 %v481_v1  ;;  %v486_v13 = vld [vmem:[#allocation7 + $0x18] sm:$0xff]  ;;  %v484_v15 = vld [vmem:[#allocation7 + $0x8] sm:$0xff]  ;;  %v483_v16 = vld [vmem:[#allocation7] sm:$0xff] }
  0x1c   :  { %256 = vmatpush.bf16.msra.mxu1 %v489_v3  ;;  %v498_v17 = vld [vmem:[#allocation8 + $0x38] sm:$0xff]  ;;  %v497_v18 = vld [vmem:[#allocation8 + $0x30] sm:$0xff]  ;;  %v496_v19 = vld [vmem:[#allocation8 + $0x28] sm:$0xff] }
  0x1d   :  { %337 = vmatpush.bf16.msra.mxu2 %v498_v17  ;;  %v495_v20 = vld [vmem:[#allocation8 + $0x20] sm:$0xff]  ;;  %v494_v29 = vld [vmem:[#allocation8 + $0x18] sm:$0xff]  ;;  %v493_v30 = vld [vmem:[#allocation8 + $0x10] sm:$0xff] }
  0x1e   :  { %v509_v22 = vld [vmem:[#allocation10] ss:$0 sm:$0xff]  ;;  %v492_v31 = vld [vmem:[#allocation8 + $0x8] sm:$0xff]  ;;  %v510_v34 = vld [vmem:[#allocation10 + $0x1] ss:$0 sm:$0xff] }
  0x1f   :  { %175 = vmatpush.bf16.msra.mxu0 %v480_v4  ;;  %v491_v32 = vld [vmem:[#allocation8] sm:$0xff] }
  0x20   :  { %257 = vmatpush.bf16.msra.mxu1 %v488_v5  ;;  %v511_v41 = vld [vmem:[#allocation10 + $0x2] ss:$0 sm:$0xff] }
  0x21   :  { %338 = vmatpush.bf16.msra.mxu2 %v497_v18 }
  0x23   :  { %176 = vmatpush.bf16.msra.mxu0 %v479_v6 }
  0x24   :  { %258 = vmatpush.bf16.msra.mxu1 %v487_v7 }
  0x25   :  { %339 = vmatpush.bf16.msra.mxu2 %v496_v19 }
  0x27   :  { %177 = vmatpush.bf16.msra.mxu0 %v478_v8 }
  0x28   :  { %259 = vmatpush.bf16.msra.mxu1 %v486_v13 }
  0x29   :  { %340 = vmatpush.bf16.msra.mxu2 %v495_v20 }
  0x2b   :  { %178 = vmatpush.bf16.msra.mxu0 %v477_v9 }
  0x2c   :  { %260 = vmatpush.bf16.msra.mxu1 %v485_v14 }
  0x2d   :  { %341 = vmatpush.bf16.msra.mxu2 %v494_v29 }
  0x2f   :  { %179 = vmatpush.bf16.msra.mxu0 %v476_v10 }
  0x30   :  { %261 = vmatpush.bf16.msra.mxu1 %v484_v15 }
  0x31   :  { %342 = vmatpush.bf16.msra.mxu2 %v493_v30 }
  0x33   :  { %180 = vmatpush.bf16.msra.mxu0 %v475_v11 }
  0x34   :  { %262 = vmatpush.bf16.msra.mxu1 %v483_v16 }
  0x35   :  { %343 = vmatpush.bf16.msra.mxu2 %v492_v31 }
  0x36   :  { %181 = vmatmul.bf16.vlgmr.msra.gmra.mxu0 %v474_v12 }
  0x39   :  { %344 = vmatpush.bf16.msra.mxu2 %v491_v32 }
  0xb3   :  { %v182_v21 = vpop.f32.mrf.mxu0 }
  0xb4   :  { %v183_v23 = vadd.f32 %v509_v22, %v182_v21 }
  0xb6   :  { %v187_v26 = vmax.f32 %v183_v23, 0.0 }
  0xbb   :  { %v184_v24 = vpop.f32.mrf.mxu0 }
  0xbc   :  { %v185_v25 = vadd.f32 %v509_v22, %v184_v24 }
  0xbe   :  { %v188_v27 = vmax.f32 %v185_v25, 0.0 }
  0xc0   :  { %v189_v28 = vpack.c.bf16 %v188_v27, %v187_v26 }
  0xc2   :  { %263 = vmatmul.bf16.vlgmr.msra.gmra.mxu1 %v189_v28 }
 0x13f   :  { %v264_v33 = vpop.f32.mrf.mxu1 }
 0x140   :  { %v265_v35 = vadd.f32 %v510_v34, %v264_v33 }
 0x142   :  { %v269_v38 = vmax.f32 %v265_v35, 0.0 }
 0x147   :  { %v266_v36 = vpop.f32.mrf.mxu1 }
 0x148   :  { %v267_v37 = vadd.f32 %v510_v34, %v266_v36 }
 0x14a   :  { %v270_v39 = vmax.f32 %v267_v37, 0.0 }
 0x14c   :  { %v271_v40 = vpack.c.bf16 %v270_v39, %v269_v38 }
 0x14e   :  { %345 = vmatmul.bf16.vlgmr.msra.gmra.mxu2 %v271_v40 }
 0x1d1   :  { %v346_v42 = vpop.f32.mrf.mxu2 }
 0x1d2   :  { %v347_v43 = vadd.f32 %v511_v41, %v346_v42 }
 0x1d4   :  { %351 = vst [vmem:[#allocation11] sm:$0xff] %v347_v43 }
 0x1d9   :  { %v348_v44 = vpop.f32.mrf.mxu2 }
 0x1da   :  { %v349_v45 = vadd.f32 %v511_v41, %v348_v44 }
 0x1dc   :  { %352 = vst [vmem:[#allocation11 + $0x8] sm:$0xff] %v349_v45 }
 0x1dd   :  { %365 = dma.vmem_to_hbm [thread:$0]  %s358_s4, 256, %s360_s19, [#allocation4], %s672_s20, %s672_s20, %s673_s21  }
 0x1de   :  { %662 = dma.done.wait [#allocation4], 256  }
 0x1df   :  { %663 = vsyncadd [#allocation4], 4294967040 }
 0x1e0   :  { %370 = vsyncpa [#allocation3], 1 }
 0x1e1   :  { %371 = vsyncpa [#allocation6], 1 }
 0x1e2   :  { %372 = vsyncpa [#allocation9], 1 }
 0x1e3   :  { %373 = vsyncpa [#allocation4], 1 }

</bundles_post_ra>
